<compile_context>
chip_gen: v7x
topology: tpu7x:2x2x1
jax: 0.10.0
libtpu: 0.0.40
codegen_flags: <defaults>
</compile_context>

<pallas_src>
import jax
import jax.numpy as jnp
from jax import lax
from jax.experimental import pallas as pl
from jax.experimental.pallas import tpu as pltpu

BN_EPS = 1e-5        # torch.nn.BatchNorm1d default eps
LRELU_SLOPE = 0.2    # StyleGAN mapping-net leaky ReLU slope


# --------------------------------------------------------------------------- #
# Small helpers
# --------------------------------------------------------------------------- #
def _round_up(x, m):
    return ((x + m - 1) // m) * m


def _vmem_capacity_bytes():
    """Physical per-core VMEM; falls back to the smallest (v7x, 64 MiB)."""
    try:
        return int(pltpu.get_tpu_info().vmem_capacity_bytes)
    except Exception:
        return 64 << 20


def _pick_tile_n(chw128, w_dim, batch, w_bytes, budget_bytes, max_tn=32768):
    """Largest multiple-of-128 output-feature tile whose double-buffered
    working set (weight + scale + bias + f32 output tile) fits budget_bytes."""
    per_col = 2 * (w_dim * w_bytes + 4 + 4 + batch * 4)   # 2x: double buffering
    tn_cap = max(128, (budget_bytes // per_col) // 128 * 128)
    return int(min(tn_cap, max_tn, chw128))


# --------------------------------------------------------------------------- #
# Stage 1: FC stack + BatchNorm + final linear + mapping net  ->  w_lat (f32)
# --------------------------------------------------------------------------- #
def _make_wlat_kernel(n_hidden, bn_training):
    def kernel(*refs):
        # ref layout:
        #   [0]                 x        (B, Din)  f32
        #   per hidden layer i: W_i (Din_i, H_i) f32, gamma_i, beta_i,
        #                       running_mean_i, running_var_i  (each (1, H_i) f32)
        #   then:               W_last (H_n, Z) f32, b_last (1, Z) f32
        #   then:               W_map (Z, Wd) f32,  b_map (1, Wd) f32
        #   [-1]                w_lat out (B, Wd)   f32
        out_ref = refs[-1]
        h = refs[0][...]
        idx = 1

        for _ in range(n_hidden):
            w_ref, g_ref, b_ref, rm_ref, rv_ref = refs[idx:idx + 5]
            idx += 5
            # Linear (bias=False), f32 matmul (stage 1 is negligible cost).
            h = jnp.dot(h, w_ref[...], preferred_element_type=jnp.float32)
            # BatchNorm1d, affine fused into one FMA: h*inv + (beta - mu*inv).
            if bn_training:   # train-mode: biased batch statistics
                mu = jnp.mean(h, axis=0, keepdims=True)
                var = jnp.mean(jnp.square(h - mu), axis=0, keepdims=True)
            else:              # eval-mode: running statistics (pretrained path)
                mu = rm_ref[...]
                var = rv_ref[...]
            inv = g_ref[...] * lax.rsqrt(var + BN_EPS)
            h = h * inv + (b_ref[...] - mu * inv)
            h = jnp.maximum(h, 0.0)                      # ReLU

        # Final Linear (with bias) -> generator latent z
        w_ref, b_ref = refs[idx], refs[idx + 1]
        idx += 2
        z = jnp.dot(h, w_ref[...], preferred_element_type=jnp.float32) + b_ref[...]

        # Synthetic StyleGAN stand-in, mapping FC + leaky-ReLU (max form).
        # TODO(synk): the real pretrained StyleGAN2-ADA synthesis network
        # (modulated convs, upsampling, noise injection, loaded from a pickle
        # checkpoint) has no in-script equivalent; a deterministic mapping +
        # linear-synthesis stand-in is used.
        wm_ref, bm_ref = refs[idx], refs[idx + 1]
        w_lat = jnp.dot(z, wm_ref[...], preferred_element_type=jnp.float32) + bm_ref[...]
        w_lat = jnp.maximum(w_lat, LRELU_SLOPE * w_lat)

        out_ref[...] = w_lat

    return kernel


# --------------------------------------------------------------------------- #
# Stage 2: tiled synthesis matmul (int8 weight stream) + image epilogue
# --------------------------------------------------------------------------- #
def _syn_kernel(wlat_ref, wq_ref, scale_ref, bias_ref, out_ref):
    # int8 -> bf16 cast is exact and hides under the HBM weight DMA
    # (kernel is weight-streaming bound).  Per-column scale factors out of the
    # K-reduction, so it is applied once in the epilogue FMA.
    w = wq_ref[...].astype(jnp.bfloat16)
    acc = jnp.dot(wlat_ref[...].astype(jnp.bfloat16), w,
                  preferred_element_type=jnp.float32)
    img = acc * scale_ref[...] + bias_ref[...]
    # Module epilogue: (x * 0.5 + 0.5).clamp(0, 1), stored lane-dense f32.
    out_ref[...] = jnp.clip(img * 0.5 + 0.5, 0.0, 1.0)


# --------------------------------------------------------------------------- #
# Parameters (synthetic, deterministic).  Stage-1 params are f32 (matches the
# PyTorch f32 Linear/BN stack); the synthesis weight is stored int8 + per-
# column f32 scale (weights-only quantization) to halve the dominant HBM
# stream, with a bf16 fallback when quantize_w_syn=False.
# --------------------------------------------------------------------------- #
def init_params(key, input_shape, hidden, z_dim, w_dim, img_chw, *,
                quantize_w_syn=True):
    din = int(input_shape[0] * input_shape[1])
    layer_dim = [din] + list(hidden)
    params = {"hidden_w": [], "bn_gamma": [], "bn_beta": [],
              "bn_mean": [], "bn_var": []}
    keys = jax.random.split(key, 6 * len(hidden) + 8)
    k = 0
    for i in range(len(hidden)):
        fan_in = layer_dim[i]
        w = jax.random.normal(keys[k], (layer_dim[i], layer_dim[i + 1]), jnp.float32)
        params["hidden_w"].append(w / jnp.sqrt(fan_in)); k += 1
        h_i = layer_dim[i + 1]
        params["bn_gamma"].append(
            1.0 + 0.1 * jax.random.normal(keys[k], (1, h_i), jnp.float32)); k += 1
        params["bn_beta"].append(
            0.1 * jax.random.normal(keys[k], (1, h_i), jnp.float32)); k += 1
        params["bn_mean"].append(
            0.1 * jax.random.normal(keys[k], (1, h_i), jnp.float32)); k += 1
        params["bn_var"].append(
            0.5 + jax.random.uniform(keys[k], (1, h_i), jnp.float32)); k += 1
        k += 1  # spare key

    params["w_last"] = (jax.random.normal(keys[k], (layer_dim[-1], z_dim), jnp.float32)
                        / jnp.sqrt(layer_dim[-1])); k += 1
    params["b_last"] = jax.random.normal(keys[k], (1, z_dim), jnp.float32) * 0.01; k += 1

    c, h, w = img_chw
    chw = c * h * w
    params["w_map"] = (jax.random.normal(keys[k], (z_dim, w_dim), jnp.float32)
                       / jnp.sqrt(z_dim)); k += 1
    params["b_map"] = jax.random.normal(keys[k], (1, w_dim), jnp.float32) * 0.01; k += 1

    w_syn = (jax.random.normal(keys[k], (w_dim, chw), jnp.float32)
             / jnp.sqrt(w_dim)); k += 1
    params["b_syn"] = jax.random.normal(keys[k], (1, chw), jnp.float32) * 0.01; k += 1

    if quantize_w_syn:
        scale = jnp.maximum(jnp.max(jnp.abs(w_syn), axis=0, keepdims=True) / 127.0,
                            1e-12)
        q = jnp.clip(jnp.round(w_syn / scale), -127, 127).astype(jnp.int8)
        params["w_syn_q"] = q
        params["w_syn_scale"] = scale.astype(jnp.float32)
    else:
        params["w_syn_q"] = w_syn.astype(jnp.bfloat16)
        params["w_syn_scale"] = jnp.ones((1, chw), jnp.float32)
    return params


# --------------------------------------------------------------------------- #
# Wrapper
# --------------------------------------------------------------------------- #
def fc2_pretrained_stylegan(x, params, img_chw, *, tile_n=None, bn_training=False):
    """x: NCHW (B, C, Ny, Nx) -> image NCHW (B, 3, H, W) in [0, 1], f32."""
    b = x.shape[0]
    x_flat = x.reshape(b, -1).astype(jnp.float32)  # nn.Flatten()
    n_hidden = len(params["hidden_w"])
    w_dim = params["w_map"].shape[1]
    c, h, w = img_chw
    chw = c * h * w

    # -- per-generation VMEM budgeting (v7x: 64 MiB, v5e/v6e: 128 MiB) --------
    vmem_cap = _vmem_capacity_bytes()
    vmem_limit = min(int(vmem_cap * 0.75), vmem_cap - (8 << 20))  # 48 / 96 MiB
    tile_budget = int(vmem_limit * 0.8)                           # headroom

    # ---- Stage 1: full-batch FC/BN/mapping stack (tiny, computed once) ------
    stage1_inputs = [x_flat]
    for i in range(n_hidden):
        stage1_inputs += [params["hidden_w"][i], params["bn_gamma"][i],
                          params["bn_beta"][i], params["bn_mean"][i],
                          params["bn_var"][i]]
    stage1_inputs += [params["w_last"], params["b_last"],
                      params["w_map"], params["b_map"]]

    w_lat = pl.pallas_call(
        _make_wlat_kernel(n_hidden, bn_training),
        out_shape=jax.ShapeDtypeStruct((b, w_dim), jnp.float32),
        in_specs=[pl.BlockSpec(memory_space=pltpu.MemorySpace.VMEM)] * len(stage1_inputs),
        out_specs=pl.BlockSpec(memory_space=pltpu.MemorySpace.VMEM),
        compiler_params=pltpu.CompilerParams(vmem_limit_bytes=vmem_limit),
    )(*stage1_inputs)

    # ---- Stage 2: synthesis matmul tiled over the output-feature axis -------
    w_syn_q = params["w_syn_q"]
    w_syn_scale = params["w_syn_scale"]
    b_syn = params["b_syn"]
    w_bytes = jnp.dtype(w_syn_q.dtype).itemsize

    chw128 = _round_up(chw, 128)
    if tile_n is None:
        tile_n = _pick_tile_n(chw128, w_dim, b, w_bytes, tile_budget)
    assert tile_n % 128 == 0, "tile_n must be a multiple of 128"

    # Pad the feature axis so every grid step sees a full, lane-dense tile.
    chw_pad = _round_up(chw, tile_n)
    if chw_pad != chw:
        pad = chw_pad - chw
        w_syn_q = jnp.pad(w_syn_q, ((0, 0), (0, pad)))
        w_syn_scale = jnp.pad(w_syn_scale, ((0, 0), (0, pad)), constant_values=1.0)
        b_syn = jnp.pad(b_syn, ((0, 0), (0, pad)))
    grid = (chw_pad // tile_n,)

    cost = pl.CostEstimate(
        flops=2 * b * w_dim * chw_pad,
        transcendentals=0,
        bytes_accessed=(w_dim * chw_pad * w_bytes   # quantized synthesis weights
                        + chw_pad * 4               # f32 per-column scale
                        + chw_pad * 4               # f32 bias
                        + b * chw_pad * 4           # f32 output
                        + b * w_dim * 4),           # f32 latents
    )

    out_flat = pl.pallas_call(
        _syn_kernel,
        out_shape=jax.ShapeDtypeStruct((b, chw_pad), jnp.float32),
        grid_spec=pltpu.PrefetchScalarGridSpec(
            num_scalar_prefetch=0,
            grid=grid,
            in_specs=[
                pl.BlockSpec((b, w_dim), lambda j: (0, 0)),        # w_lat, resident
                pl.BlockSpec((w_dim, tile_n), lambda j: (0, j)),   # int8 weight tile
                pl.BlockSpec((1, tile_n), lambda j: (0, j)),       # scale tile
                pl.BlockSpec((1, tile_n), lambda j: (0, j)),       # bias tile
            ],
            out_specs=pl.BlockSpec((b, tile_n), lambda j: (0, j)),
        ),
        compiler_params=pltpu.CompilerParams(
            dimension_semantics=("parallel",),   # shard tiles across v7x's 2 TCs
            vmem_limit_bytes=vmem_limit,
        ),
        cost_estimate=cost,
    )(w_lat, w_syn_q, w_syn_scale, b_syn)

    return out_flat[:, :chw].reshape(b, c, h, w)


# --------------------------------------------------------------------------- #
# Pure-JAX reference (same math, dequantized weights) for correctness check
# --------------------------------------------------------------------------- #
def _reference_forward(x, params, img_chw, *, bn_training=False):
    b = x.shape[0]
    h = x.reshape(b, -1).astype(jnp.float32)
    for i in range(len(params["hidden_w"])):
        h = h @ params["hidden_w"][i]
        if bn_training:
            mu = jnp.mean(h, axis=0, keepdims=True)
            var = jnp.mean(jnp.square(h - mu), axis=0, keepdims=True)
        else:
            mu, var = params["bn_mean"][i], params["bn_var"][i]
        h = (h - mu) / jnp.sqrt(var + BN_EPS) * params["bn_gamma"][i] + params["bn_beta"][i]
        h = jnp.maximum(h, 0.0)
    z = h @ params["w_last"] + params["b_last"]
    wl = z @ params["w_map"] + params["b_map"]
    wl = jnp.maximum(wl, LRELU_SLOPE * wl)
    w_syn = params["w_syn_q"].astype(jnp.float32) * params["w_syn_scale"]
    img = jnp.clip((wl @ w_syn + params["b_syn"]) * 0.5 + 0.5, 0.0, 1.0)
    c, hh, ww = img_chw
    return img.reshape(b, c, hh, ww)


if __name__ == "__main__":
    key = jax.random.PRNGKey(0)
    k_x, k_p = jax.random.split(key)

    # Small, module-consistent shapes (feature dims kept lane-dense).
    batch = 2
    input_shape = (16, 16)          # Ny x Nx  -> Din = 256 (1-channel input)
    hidden = [256, 128]             # two hidden FC layers
    z_dim = 128                     # synthetic generator latent dim (G.z_dim)
    w_dim = 128                     # synthetic mapping-net width
    img_chw = (3, 16, 16)           # synthetic generator output -> CHW = 768

    x = jax.random.normal(k_x, (batch, 1, input_shape[0], input_shape[1]), jnp.float32)
    params = init_params(k_p, input_shape, hidden, z_dim, w_dim, img_chw)

    # tile_n is auto-derived from the per-generation VMEM budget (largest
    # multiple-of-128 tile that double-buffers inside ~80% of the scoped limit).
    out = fc2_pretrained_stylegan(x, params, img_chw)
    out = jax.block_until_ready(out)

    assert out.shape == (batch,) + img_chw
    assert bool(jnp.all(out >= 0.0)) and bool(jnp.all(out <= 1.0))

    ref = _reference_forward(x, params, img_chw)
    max_err = float(jnp.max(jnp.abs(out - ref)))
    assert max_err < 7.5e-2, f"mismatch vs reference: {max_err}"

    print("KERNEL_OK")
</pallas_src>

<mosaic_0001>
module attributes {stable_mosaic.version = 11 : i64} {
  func.func @kernel(%arg0: memref<2x256xf32, #tpu.memory_space<vmem>>, %arg1: memref<256x256xf32, #tpu.memory_space<vmem>>, %arg2: memref<1x256xf32, #tpu.memory_space<vmem>>, %arg3: memref<1x256xf32, #tpu.memory_space<vmem>>, %arg4: memref<1x256xf32, #tpu.memory_space<vmem>>, %arg5: memref<1x256xf32, #tpu.memory_space<vmem>>, %arg6: memref<256x128xf32, #tpu.memory_space<vmem>>, %arg7: memref<1x128xf32, #tpu.memory_space<vmem>>, %arg8: memref<1x128xf32, #tpu.memory_space<vmem>>, %arg9: memref<1x128xf32, #tpu.memory_space<vmem>>, %arg10: memref<1x128xf32, #tpu.memory_space<vmem>>, %arg11: memref<128x128xf32, #tpu.memory_space<vmem>>, %arg12: memref<1x128xf32, #tpu.memory_space<vmem>>, %arg13: memref<128x128xf32, #tpu.memory_space<vmem>>, %arg14: memref<1x128xf32, #tpu.memory_space<vmem>>, %arg15: memref<2x128xf32, #tpu.memory_space<vmem>>) attributes {dimension_semantics = [], scalar_prefetch = 0 : i64, scratch_operands = 0 : i64, tpu.core_type = #tpu.core_type<tc>} {
    %c0 = arith.constant 0 : index
    %c0_0 = arith.constant 0 : index
    %0 = vector.load %arg0[%c0, %c0_0] : memref<2x256xf32, #tpu.memory_space<vmem>>, vector<2x256xf32>
    %c0_1 = arith.constant 0 : index
    %c0_2 = arith.constant 0 : index
    %1 = vector.load %arg1[%c0_1, %c0_2] : memref<256x256xf32, #tpu.memory_space<vmem>>, vector<256x256xf32>
    %cst = arith.constant dense<0.000000e+00> : vector<2x256xf32>
    %2 = tpu.matmul %0, %1, %cst {dimension_numbers = #tpu.dot_dimension_numbers<[1], [0], [0], [1], [0, 0, 1, 1], [], []>} : vector<2x256xf32>, vector<256x256xf32>, vector<2x256xf32> -> vector<2x256xf32>
    %c0_3 = arith.constant 0 : index
    %c0_4 = arith.constant 0 : index
    %3 = vector.load %arg4[%c0_3, %c0_4] : memref<1x256xf32, #tpu.memory_space<vmem>>, vector<1x256xf32>
    %c0_5 = arith.constant 0 : index
    %c0_6 = arith.constant 0 : index
    %4 = vector.load %arg5[%c0_5, %c0_6] : memref<1x256xf32, #tpu.memory_space<vmem>>, vector<1x256xf32>
    %c0_7 = arith.constant 0 : index
    %c0_8 = arith.constant 0 : index
    %5 = vector.load %arg2[%c0_7, %c0_8] : memref<1x256xf32, #tpu.memory_space<vmem>>, vector<1x256xf32>
    %cst_9 = arith.constant 9.99999974E-6 : f32
    %6 = vector.broadcast %cst_9 : f32 to vector<1x256xf32>
    %7 = arith.addf %4, %6 : vector<1x256xf32>
    %8 = math.rsqrt %7 : vector<1x256xf32>
    %9 = arith.mulf %5, %8 : vector<1x256xf32>
    %10 = vector.broadcast %9 : vector<1x256xf32> to vector<2x256xf32>
    %11 = arith.mulf %2, %10 : vector<2x256xf32>
    %c0_10 = arith.constant 0 : index
    %c0_11 = arith.constant 0 : index
    %12 = vector.load %arg3[%c0_10, %c0_11] : memref<1x256xf32, #tpu.memory_space<vmem>>, vector<1x256xf32>
    %13 = arith.mulf %3, %9 : vector<1x256xf32>
    %14 = arith.subf %12, %13 : vector<1x256xf32>
    %15 = vector.broadcast %14 : vector<1x256xf32> to vector<2x256xf32>
    %16 = arith.addf %11, %15 : vector<2x256xf32>
    %cst_12 = arith.constant 0.000000e+00 : f32
    %17 = vector.broadcast %cst_12 : f32 to vector<2x256xf32>
    %18 = arith.maximumf %16, %17 : vector<2x256xf32>
    %c0_13 = arith.constant 0 : index
    %c0_14 = arith.constant 0 : index
    %19 = vector.load %arg6[%c0_13, %c0_14] : memref<256x128xf32, #tpu.memory_space<vmem>>, vector<256x128xf32>
    %cst_15 = arith.constant dense<0.000000e+00> : vector<2x128xf32>
    %20 = tpu.matmul %18, %19, %cst_15 {dimension_numbers = #tpu.dot_dimension_numbers<[1], [0], [0], [1], [0, 0, 1, 1], [], []>} : vector<2x256xf32>, vector<256x128xf32>, vector<2x128xf32> -> vector<2x128xf32>
    %c0_16 = arith.constant 0 : index
    %c0_17 = arith.constant 0 : index
    %21 = vector.load %arg9[%c0_16, %c0_17] : memref<1x128xf32, #tpu.memory_space<vmem>>, vector<1x128xf32>
    %c0_18 = arith.constant 0 : index
    %c0_19 = arith.constant 0 : index
    %22 = vector.load %arg10[%c0_18, %c0_19] : memref<1x128xf32, #tpu.memory_space<vmem>>, vector<1x128xf32>
    %c0_20 = arith.constant 0 : index
    %c0_21 = arith.constant 0 : index
    %23 = vector.load %arg7[%c0_20, %c0_21] : memref<1x128xf32, #tpu.memory_space<vmem>>, vector<1x128xf32>
    %cst_22 = arith.constant 9.99999974E-6 : f32
    %24 = vector.broadcast %cst_22 : f32 to vector<1x128xf32>
    %25 = arith.addf %22, %24 : vector<1x128xf32>
    %26 = math.rsqrt %25 : vector<1x128xf32>
    %27 = arith.mulf %23, %26 : vector<1x128xf32>
    %28 = vector.broadcast %27 : vector<1x128xf32> to vector<2x128xf32>
    %29 = arith.mulf %20, %28 : vector<2x128xf32>
    %c0_23 = arith.constant 0 : index
    %c0_24 = arith.constant 0 : index
    %30 = vector.load %arg8[%c0_23, %c0_24] : memref<1x128xf32, #tpu.memory_space<vmem>>, vector<1x128xf32>
    %31 = arith.mulf %21, %27 : vector<1x128xf32>
    %32 = arith.subf %30, %31 : vector<1x128xf32>
    %33 = vector.broadcast %32 : vector<1x128xf32> to vector<2x128xf32>
    %34 = arith.addf %29, %33 : vector<2x128xf32>
    %cst_25 = arith.constant 0.000000e+00 : f32
    %35 = vector.broadcast %cst_25 : f32 to vector<2x128xf32>
    %36 = arith.maximumf %34, %35 : vector<2x128xf32>
    %c0_26 = arith.constant 0 : index
    %c0_27 = arith.constant 0 : index
    %37 = vector.load %arg11[%c0_26, %c0_27] : memref<128x128xf32, #tpu.memory_space<vmem>>, vector<128x128xf32>
    %cst_28 = arith.constant dense<0.000000e+00> : vector<2x128xf32>
    %38 = tpu.matmul %36, %37, %cst_28 {dimension_numbers = #tpu.dot_dimension_numbers<[1], [0], [0], [1], [0, 0, 1, 1], [], []>} : vector<2x128xf32>, vector<128x128xf32>, vector<2x128xf32> -> vector<2x128xf32>
    %c0_29 = arith.constant 0 : index
    %c0_30 = arith.constant 0 : index
    %39 = vector.load %arg12[%c0_29, %c0_30] : memref<1x128xf32, #tpu.memory_space<vmem>>, vector<1x128xf32>
    %40 = vector.broadcast %39 : vector<1x128xf32> to vector<2x128xf32>
    %41 = arith.addf %38, %40 : vector<2x128xf32>
    %c0_31 = arith.constant 0 : index
    %c0_32 = arith.constant 0 : index
    %42 = vector.load %arg13[%c0_31, %c0_32] : memref<128x128xf32, #tpu.memory_space<vmem>>, vector<128x128xf32>
    %cst_33 = arith.constant dense<0.000000e+00> : vector<2x128xf32>
    %43 = tpu.matmul %41, %42, %cst_33 {dimension_numbers = #tpu.dot_dimension_numbers<[1], [0], [0], [1], [0, 0, 1, 1], [], []>} : vector<2x128xf32>, vector<128x128xf32>, vector<2x128xf32> -> vector<2x128xf32>
    %c0_34 = arith.constant 0 : index
    %c0_35 = arith.constant 0 : index
    %44 = vector.load %arg14[%c0_34, %c0_35] : memref<1x128xf32, #tpu.memory_space<vmem>>, vector<1x128xf32>
    %45 = vector.broadcast %44 : vector<1x128xf32> to vector<2x128xf32>
    %46 = arith.addf %43, %45 : vector<2x128xf32>
    %cst_36 = arith.constant 2.000000e-01 : f32
    %47 = vector.broadcast %cst_36 : f32 to vector<2x128xf32>
    %48 = arith.mulf %47, %46 : vector<2x128xf32>
    %49 = arith.maximumf %46, %48 : vector<2x128xf32>
    %c0_37 = arith.constant 0 : index
    %c0_38 = arith.constant 0 : index
    %50 = vector.load %arg15[%c0_37, %c0_38] : memref<2x128xf32, #tpu.memory_space<vmem>>, vector<2x128xf32>
    tpu.vector_store %arg15[%c0_37, %c0_38], %49 {strides = array<i32>} : memref<2x128xf32, #tpu.memory_space<vmem>>, vector<2x128xf32>,
    return
  }
}

</mosaic_0001>

<bundles_post_ra>
// kernel: tpu_custom_call.1
= control target key start
LH: loop header
LB: loop body
LE: loop exit
PB: predicated region body
PF: predicated region fallthrough
CT: control target
= control target key end

     0   :  { %s1307_s0 = inlined_call_operand.hbm [shape: f32[2,256], index: 0, kind: input, shape index: {}]   ;;  %s1308_s1 = inlined_call_operand.hbm [shape: f32[256,256], index: 1, kind: input, shape index: {}]   ;;  %s1309_s2 = inlined_call_operand.vmem [shape: f32[1,256], index: 2, kind: input, shape index: {}]   ;;  %s1310_s3 = inlined_call_operand.vmem [shape: f32[1,256], index: 3, kind: input, shape index: {}]   ;;  %s1311_s4 = inlined_call_operand.vmem [shape: f32[1,256], index: 4, kind: input, shape index: {}]   ;;  %s1312_s5 = inlined_call_operand.vmem [shape: f32[1,256], index: 5, kind: input, shape index: {}]   ;;  %s1313_s6 = inlined_call_operand.hbm [shape: f32[256,128], index: 6, kind: input, shape index: {}]   ;;  %s1314_s7 = inlined_call_operand.vmem [shape: f32[1,128], index: 7, kind: input, shape index: {}]   ;;  %s1315_s8 = inlined_call_operand.vmem [shape: f32[1,128], index: 8, kind: input, shape index: {}]   ;;  %s1316_s9 = inlined_call_operand.vmem [shape: f32[1,128], index: 9, kind: input, shape index: {}]   ;;  %s1317_s10 = inlined_call_operand.vmem [shape: f32[1,128], index: 10, kind: input, shape index: {}]   ;;  %s1318_s11 = inlined_call_operand.hbm [shape: f32[128,128], index: 11, kind: input, shape index: {}]   ;;  %s1319_s12 = inlined_call_operand.vmem [shape: f32[1,128], index: 12, kind: input, shape index: {}]   ;;  %s1320_s13 = inlined_call_operand.hbm [shape: f32[128,128], index: 13, kind: input, shape index: {}]   ;;  %s1321_s14 = inlined_call_operand.vmem [shape: f32[1,128], index: 14, kind: input, shape index: {}]   ;;  %s1322_s15 = inlined_call_operand.hbm [shape: f32[2,128], index: 15, kind: output, shape index: {}]  }
   0x1   :  { %1324 = sst [smem:[#allocation16_spill]] %s1322_s15 }
   0x2   :  { %20 = vsyncpa [#allocation3], 0 }
   0x3   :  { %21 = vsyncpa [#allocation6], 0 }
   0x4   :  { %22 = vsyncpa [#allocation9], 0 }
   0x5   :  { %23 = vsyncpa [#allocation4], 0  ;;  %s1076_s18 = smov [#allocation5]   ;;  %s936_s22 = scalar_lea.hbm %s1308_s1, 8192 }
   0x6   :  { %s39_s19 = sshll.u32 %s1076_s18, 4  ;;  %p937_p0 = scmp.ne.s32.totalorder %s1308_s1, %s936_s22  ;;  %s40_s19 = int_to_ptr.vmem [resolvable:$true] %s39_s19 }
   0x7   :  { %p940_p1 = scmp.lt.u32.totalorder %s936_s22, %s1308_s1 }
   0x9   :  { %p942_p2 = pnand %p940_p1, %p937_p0 }
   0xb   :  { %945 = shalt.err (!%p942_p2)
}
   0xc   :  { %s946_s27 = scalar_lea.vmem %s40_s19, 8192  ;;  %p951_p4 = scmp.lt.s32.totalorder %s40_s19, %s40_s19 }
   0xd   :  { %p947_p3 = scmp.ne.s32.totalorder %s40_s19, %s946_s27  ;;  %p952_p5 = scmp.lt.s32.totalorder %s946_s27, %s946_s27 }
   0xf   :  { %p953_p6 = por %p952_p5, %p951_p4 }
  0x11   :  { %p954_p7 = pnand %p953_p6, %p947_p3 }
  0x13   :  { %957 = shalt.err (!%p954_p7)
}
  0x14   :  { %s1077_s28 = smov 256   ;;  %s1078_s29 = smov 16  }
  0x15   :  { %45 = dma.hbm_to_vmem [thread:$0]  %s1308_s1, 8192, %s40_s19, [#allocation6], %s1077_s28, %s1077_s28, %s1078_s29  }
  0x16   :  { %s1079_s17 = smov [#allocation8]   ;;  %s1080_s20 = smov [#allocation2]  }
  0x17   :  { %s79_s18 = sshll.u32 %s1079_s17, 4  ;;  %s30_s21 = sshll.u32 %s1080_s20, 4  ;;  %s80_s18 = int_to_ptr.vmem [resolvable:$true] %s79_s18  ;;  %s31_s21 = int_to_ptr.vmem [resolvable:$true] %s30_s21 }
  0x18   :  { %s958_s24 = scalar_lea.hbm %s1318_s11, 2048 }
  0x19   :  { %p959_p8 = scmp.ne.s32.totalorder %s1318_s11, %s958_s24  ;;  %p962_p9 = scmp.lt.u32.totalorder %s958_s24, %s1318_s11 }
  0x1b   :  { %p964_p10 = pnand %p962_p9, %p959_p8 }
  0x1d   :  { %967 = shalt.err (!%p964_p10)
}
  0x1e   :  { %s968_s1 = scalar_lea.vmem %s80_s18, 2048  ;;  %p973_p12 = scmp.lt.s32.totalorder %s80_s18, %s80_s18 }
  0x1f   :  { %p969_p11 = scmp.ne.s32.totalorder %s80_s18, %s968_s1  ;;  %p974_p13 = scmp.lt.s32.totalorder %s968_s1, %s968_s1 }
  0x21   :  { %p975_p0 = por %p974_p13, %p973_p12 }
  0x23   :  { %p976_p1 = pnand %p975_p0, %p969_p11 }
  0x25   :  { %979 = shalt.err (!%p976_p1)
}
  0x26   :  { %s1081_s19 = smov 128   ;;  %s1082_s28 = smov 8  }
  0x27   :  { %85 = dma.hbm_to_vmem [thread:$0]  %s1318_s11, 2048, %s80_s18, [#allocation9], %s1081_s19, %s1081_s19, %s1082_s28  }
  0x28   :  { %s980_s17 = scalar_lea.hbm %s1307_s0, 64 }
  0x29   :  { %p981_p2 = scmp.ne.s32.totalorder %s1307_s0, %s980_s17  ;;  %p984_p3 = scmp.lt.u32.totalorder %s980_s17, %s1307_s0 }
  0x2b   :  { %p986_p4 = pnand %p984_p3, %p981_p2 }
  0x2d   :  { %989 = shalt.err (!%p986_p4)
}
  0x2e   :  { %s990_s25 = scalar_lea.vmem %s31_s21, 64  ;;  %p995_p6 = scmp.lt.s32.totalorder %s31_s21, %s31_s21 }
  0x2f   :  { %p991_p5 = scmp.ne.s32.totalorder %s31_s21, %s990_s25  ;;  %p996_p7 = scmp.lt.s32.totalorder %s990_s25, %s990_s25 }
  0x31   :  { %p997_p8 = por %p996_p7, %p995_p6 }
  0x33   :  { %p998_p9 = pnand %p997_p8, %p991_p5 }
  0x35   :  { %1001 = shalt.err (!%p998_p9)
}
  0x36   :  { %33 = dma.hbm_to_vmem [thread:$0]  %s1307_s0, 64, %s31_s21, [#allocation3]  }
  0x37   :  { %s1083_s26 = smov [#allocation7]   ;;  %s1084_s1 = smov [#allocation10]  }
  0x38   :  { %s59_s27 = sshll.u32 %s1083_s26, 4  ;;  %s93_s29 = sshll.u32 %s1084_s1, 4  ;;  %s60_s27 = int_to_ptr.vmem [resolvable:$true] %s59_s27  ;;  %s94_s29 = int_to_ptr.vmem [resolvable:$true] %s93_s29 }
  0x39   :  { %s1002_s16 = scalar_lea.hbm %s1313_s6, 4096 }
  0x3a   :  { %p1003_p10 = scmp.ne.s32.totalorder %s1313_s6, %s1002_s16  ;;  %p1006_p11 = scmp.lt.u32.totalorder %s1002_s16, %s1313_s6 }
  0x3c   :  { %p1008_p12 = pnand %p1006_p11, %p1003_p10 }
  0x3e   :  { %1011 = shalt.err (!%p1008_p12)
}
  0x3f   :  { %s1012_s0 = scalar_lea.vmem %s60_s27, 4096  ;;  %p1017_p0 = scmp.lt.s32.totalorder %s60_s27, %s60_s27 }
  0x40   :  { %p1013_p13 = scmp.ne.s32.totalorder %s60_s27, %s1012_s0  ;;  %p1018_p1 = scmp.lt.s32.totalorder %s1012_s0, %s1012_s0 }
  0x42   :  { %p1019_p2 = por %p1018_p1, %p1017_p0 }
  0x44   :  { %p1020_p3 = pnand %p1019_p2, %p1013_p13 }
  0x46   :  { %1023 = shalt.err (!%p1020_p3)
}
  0x47   :  { %65 = dma.hbm_to_vmem [thread:$0]  %s1313_s6, 4096, %s60_s27, [#allocation6], %s1081_s19, %s1081_s19, %s1082_s28  }
  0x48   :  { %s1024_s18 = scalar_lea.hbm %s1320_s13, 2048 }
  0x49   :  { %p1025_p4 = scmp.ne.s32.totalorder %s1320_s13, %s1024_s18  ;;  %p1028_p5 = scmp.lt.u32.totalorder %s1024_s18, %s1320_s13 }
  0x4b   :  { %p1030_p6 = pnand %p1028_p5, %p1025_p4 }
  0x4d   :  { %1033 = shalt.err (!%p1030_p6)
}
  0x4e   :  { %s1034_s16 = scalar_lea.vmem %s94_s29, 2048  ;;  %p1039_p8 = scmp.lt.s32.totalorder %s94_s29, %s94_s29 }
  0x4f   :  { %p1035_p7 = scmp.ne.s32.totalorder %s94_s29, %s1034_s16  ;;  %p1040_p9 = scmp.lt.s32.totalorder %s1034_s16, %s1034_s16 }
  0x51   :  { %p1041_p10 = por %p1040_p9, %p1039_p8 }
  0x53   :  { %p1042_p11 = pnand %p1041_p10, %p1035_p7 }
  0x55   :  { %1045 = shalt.err (!%p1042_p11)
}
  0x56   :  { %99 = dma.hbm_to_vmem [thread:$0]  %s1320_s13, 2048, %s94_s29, [#allocation9], %s1081_s19, %s1081_s19, %s1082_s28  }
  0x57   :  { %1068 = dma.done.wait [#allocation3], 64  }
  0x58   :  { %1069 = vsyncadd [#allocation3], 4294967232 }
  0x59   :  { %1070 = dma.done.wait [#allocation6], 12288  }
  0x5a   :  { %1071 = vsyncadd [#allocation6], 4294955008 }
  0x5b   :  { %1072 = dma.done.wait [#allocation9], 4096  }
  0x5c   :  { %1073 = vsyncadd [#allocation9], 4294963200  ;;  %v119_v0 = vld [vmem:[#allocation5 + $0x8] sm:$0xff]  ;;  %v121_v1 = vld [vmem:[#allocation5 + $0x18] sm:$0xff]  ;;  %vm1086_vm0 = vmmov 0   ;;  %s1088_s11 = smov [#allocation11]  }
  0x5d   :  { %v118_v2 = vld [vmem:[#allocation5] sm:$0xff]  ;;  %v775_v3 = vpack.c.bf16 %v121_v1, %v119_v0  ;;  %v120_v4 = vld [vmem:[#allocation5 + $0x10] sm:$0xff]  ;;  %v123_v5 = vld [vmem:[#allocation5 + $0x28] sm:$0xff]  ;;  %s622_s18 = sshll.u32 %s1088_s11, 4  ;;  %s623_s18 = int_to_ptr.vmem [resolvable:$true] %s622_s18 }
  0x5e   :  { %v125_v6 = vld [vmem:[#allocation5 + $0x38] sm:$0xff]  ;;  %v777_v7 = vpack.c.bf16 %v120_v4, %v118_v2  ;;  %v122_v9 = vld [vmem:[#allocation5 + $0x20] sm:$0xff]  ;;  %v124_v10 = vld [vmem:[#allocation5 + $0x30] sm:$0xff]  ;;  %s1046_s26 = scalar_lea.vmem %s623_s18, 32  ;;  %p1051_p13 = scmp.lt.s32.totalorder %s623_s18, %s623_s18 }
  0x5f   :  { %v779_v8 = vpack.c.bf16 %v125_v6, %v123_v5  ;;  %v127_v11 = vld [vmem:[#allocation5 + $0x48] sm:$0xff]  ;;  %776 = vmatprep.subr.bf16.mxu0 %v775_v3  ;;  %v129_v12 = vld [vmem:[#allocation5 + $0x58] sm:$0xff]  ;;  %v781_v13 = vpack.c.bf16 %v124_v10, %v122_v9  ;;  %v126_v15 = vld [vmem:[#allocation5 + $0x40] sm:$0xff]  ;;  %p1047_p12 = scmp.ne.s32.totalorder %s623_s18, %s1046_s26  ;;  %p1052_p0 = scmp.lt.s32.totalorder %s1046_s26, %s1046_s26 }
  0x60   :  { %778 = vmatpush1.bf16.msra.mxu0 %v777_v7  ;;  %v783_v14 = vpack.c.bf16 %v129_v12, %v127_v11  ;;  %v128_v16 = vld [vmem:[#allocation5 + $0x50] sm:$0xff]  ;;  %v131_v17 = vld [vmem:[#allocation5 + $0x68] sm:$0xff]  ;;  %v133_v18 = vld [vmem:[#allocation5 + $0x78] sm:$0xff] }
  0x61   :  { %780 = vmatprep.subr.bf16.mxu0 %v779_v8  ;;  %v785_v19 = vpack.c.bf16 %v128_v16, %v126_v15  ;;  %v787_v20 = vpack.c.bf16 %v133_v18, %v131_v17  ;;  %v130_v21 = vld [vmem:[#allocation5 + $0x60] sm:$0xff]  ;;  %v132_v22 = vld [vmem:[#allocation5 + $0x70] sm:$0xff]  ;;  %v135_v23 = vld [vmem:[#allocation5 + $0x88] sm:$0xff]  ;;  %p1053_p1 = por %p1052_p0, %p1051_p13 }
  0x62   :  { %v137_v24 = vld [vmem:[#allocation5 + $0x98] sm:$0xff]  ;;  %v789_v25 = vpack.c.bf16 %v132_v22, %v130_v21  ;;  %v134_v27 = vld [vmem:[#allocation5 + $0x80] sm:$0xff]  ;;  %v136_v28 = vld [vmem:[#allocation5 + $0x90] sm:$0xff] }
  0x63   :  { %v791_v26 = vpack.c.bf16 %v137_v24, %v135_v23  ;;  %v139_v29 = vld [vmem:[#allocation5 + $0xa8] sm:$0xff]  ;;  %v141_v30 = vld [vmem:[#allocation5 + $0xb8] sm:$0xff]  ;;  %v793_v31 = vpack.c.bf16 %v136_v28, %v134_v27  ;;  %v138_v33 = vld [vmem:[#allocation5 + $0xa0] sm:$0xff]  ;;  %p1054_p2 = pnand %p1053_p1, %p1047_p12 }
  0x64   :  { %782 = vmatpush1.bf16.msra.mxu0 %v781_v13  ;;  %v795_v32 = vpack.c.bf16 %v141_v30, %v139_v29  ;;  %v140_v34 = vld [vmem:[#allocation5 + $0xb0] sm:$0xff]  ;;  %v143_v35 = vld [vmem:[#allocation5 + $0xc8] sm:$0xff]  ;;  %v145_v36 = vld [vmem:[#allocation5 + $0xd8] sm:$0xff] }
  0x65   :  { %784 = vmatprep.subr.bf16.mxu0 %v783_v14  ;;  %v797_v37 = vpack.c.bf16 %v140_v34, %v138_v33  ;;  %v142_v38 = vld [vmem:[#allocation5 + $0xc0] sm:$0xff]  ;;  %v144_v39 = vld [vmem:[#allocation5 + $0xd0] sm:$0xff]  ;;  %v147_v40 = vld [vmem:[#allocation5 + $0xe8] sm:$0xff]  ;;  %v799_v41 = vpack.c.bf16 %v145_v36, %v143_v35 }
  0x66   :  { %v149_v42 = vld [vmem:[#allocation5 + $0xf8] sm:$0xff]  ;;  %v317_v44 = vld [vmem:[#allocation7 + $0x80] sm:$0xff]  ;;  %v318_v46 = vld [vmem:[#allocation7 + $0x88] sm:$0xff]  ;;  %v801_v54 = vpack.c.bf16 %v144_v39, %v142_v38 }
  0x67   :  { %v1238_v43 = vld.sshfl [vmem:[#allocation2] sm:$0x33 pattern:$0x76325410]  ;;  %v301_v47 = vld [vmem:[#allocation7] sm:$0xff]  ;;  %v302_v48 = vld [vmem:[#allocation7 + $0x8] sm:$0xff]  ;;  %v839_v49 = vpack.c.bf16 %v318_v46, %v317_v44  ;;  %v803_v59 = vpack.c.bf16 %v149_v42, %v147_v40 }
  0x68   :  { %786 = vmatpush1.bf16.msra.mxu0 %v785_v19  ;;  %v190_v45 = vcombine.high %v1238_v43, %v1238_v43  ;;  %v841_v50 = vpack.c.bf16 %v302_v48, %v301_v47  ;;  %v319_v51 = vld [vmem:[#allocation7 + $0x90] sm:$0xff]  ;;  %v320_v52 = vld [vmem:[#allocation7 + $0x98] sm:$0xff]  ;;  %v321_v57 = vld [vmem:[#allocation7 + $0xa0] sm:$0xff] }
  0x69   :  { %788 = vmatprep.subr.bf16.mxu0 %v787_v20  ;;  %v303_v53 = vld [vmem:[#allocation7 + $0x10] sm:$0xff]  ;;  %v843_v55 = vpack.c.bf16 %v320_v52, %v319_v51  ;;  %v304_v56 = vld [vmem:[#allocation7 + $0x18] sm:$0xff]  ;;  %v322_v58 = vld [vmem:[#allocation7 + $0xa8] sm:$0xff]  ;;  %840 = vmatprep.subr.bf16.mxu1 %v839_v49 }
  0x6a   :  { %257 = vmatprep.mubr.f32.mxu0 %v190_v45  ;;  %v146_v60 = vld [vmem:[#allocation5 + $0xe0] sm:$0xff]  ;;  %v148_v61 = vld [vmem:[#allocation5 + $0xf0] sm:$0xff]  ;;  %v151_v62 = vld [vmem:[#allocation5 + $0x108] sm:$0xff]  ;;  %842 = vmatpush3.bf16.msra.mxu1 %v841_v50  ;;  %v845_v0 = vpack.c.bf16 %v304_v56, %v303_v53  ;;  %v847_v1 = vpack.c.bf16 %v322_v58, %v321_v57 }
  0x6b   :  { %v153_v63 = vld [vmem:[#allocation5 + $0x118] sm:$0xff]  ;;  %844 = vmatprep.subr.bf16.mxu1 %v843_v55  ;;  %v305_v2 = vld [vmem:[#allocation7 + $0x20] sm:$0xff]  ;;  %v306_v3 = vld [vmem:[#allocation7 + $0x28] sm:$0xff]  ;;  %v805_v4 = vpack.c.bf16 %v148_v61, %v146_v60 }
  0x6c   :  { %790 = vmatpush1.bf16.msra.mxu0 %v789_v25  ;;  %v323_v5 = vld [vmem:[#allocation7 + $0xb0] sm:$0xff]  ;;  %v324_v6 = vld [vmem:[#allocation7 + $0xb8] sm:$0xff]  ;;  %v807_v7 = vpack.c.bf16 %v153_v63, %v151_v62  ;;  %v150_v8 = vld [vmem:[#allocation5 + $0x100] sm:$0xff]  ;;  %v849_v12 = vpack.c.bf16 %v306_v3, %v305_v2 }
  0x6d   :  { %792 = vmatprep.subr.bf16.mxu0 %v791_v26  ;;  %v152_v9 = vld [vmem:[#allocation5 + $0x110] sm:$0xff]  ;;  %v155_v10 = vld [vmem:[#allocation5 + $0x128] sm:$0xff]  ;;  %v157_v11 = vld [vmem:[#allocation5 + $0x138] sm:$0xff]  ;;  %v851_v13 = vpack.c.bf16 %v324_v6, %v323_v5 }
  0x6e   :  { %846 = vmatpush3.bf16.msra.mxu1 %v845_v0  ;;  %v307_v14 = vld [vmem:[#allocation7 + $0x30] sm:$0xff]  ;;  %v308_v15 = vld [vmem:[#allocation7 + $0x38] sm:$0xff]  ;;  %v809_v16 = vpack.c.bf16 %v152_v9, %v150_v8  ;;  %v325_v17 = vld [vmem:[#allocation7 + $0xc0] sm:$0xff]  ;;  %v811_v19 = vpack.c.bf16 %v157_v11, %v155_v10 }
  0x6f   :  { %848 = vmatprep.subr.bf16.mxu1 %v847_v1  ;;  %v326_v18 = vld [vmem:[#allocation7 + $0xc8] sm:$0xff]  ;;  %v154_v20 = vld [vmem:[#allocation5 + $0x120] sm:$0xff]  ;;  %v156_v21 = vld [vmem:[#allocation5 + $0x130] sm:$0xff]  ;;  %v853_v24 = vpack.c.bf16 %v308_v15, %v307_v14 }
  0x70   :  { %794 = vmatpush1.bf16.msra.mxu0 %v793_v31  ;;  %v159_v22 = vld [vmem:[#allocation5 + $0x148] sm:$0xff]  ;;  %v161_v23 = vld [vmem:[#allocation5 + $0x158] sm:$0xff]  ;;  %v855_v25 = vpack.c.bf16 %v326_v18, %v325_v17  ;;  %v309_v26 = vld [vmem:[#allocation7 + $0x40] sm:$0xff]  ;;  %v813_v28 = vpack.c.bf16 %v156_v21, %v154_v20 }
  0x71   :  { %796 = vmatprep.subr.bf16.mxu0 %v795_v32  ;;  %v310_v27 = vld [vmem:[#allocation7 + $0x48] sm:$0xff]  ;;  %v327_v29 = vld [vmem:[#allocation7 + $0xd0] sm:$0xff]  ;;  %v328_v30 = vld [vmem:[#allocation7 + $0xd8] sm:$0xff]  ;;  %v815_v31 = vpack.c.bf16 %v161_v23, %v159_v22  ;;  %v271_v23 = vlaneseq }
  0x72   :  { %850 = vmatpush3.bf16.msra.mxu1 %v849_v12  ;;  %v158_v32 = vld [vmem:[#allocation5 + $0x140] sm:$0xff]  ;;  %v160_v33 = vld [vmem:[#allocation5 + $0x150] sm:$0xff]  ;;  %v163_v34 = vld [vmem:[#allocation5 + $0x168] sm:$0xff]  ;;  %v857_v36 = vpack.c.bf16 %v310_v27, %v309_v26 }
  0x73   :  { %852 = vmatprep.subr.bf16.mxu1 %v851_v13  ;;  %v165_v35 = vld [vmem:[#allocation5 + $0x178] sm:$0xff]  ;;  %v311_v38 = vld [vmem:[#allocation7 + $0x50] sm:$0xff]  ;;  %v817_v40 = vpack.c.bf16 %v160_v33, %v158_v32  ;;  %v162_v42 = vld [vmem:[#allocation5 + $0x160] sm:$0xff]  ;;  %v272_v26 = vshrl.u32 %v271_v23, 7 }
  0x74   :  { %798 = vmatpush1.bf16.msra.mxu0 %v797_v37  ;;  %v859_v37 = vpack.c.bf16 %v328_v30, %v327_v29  ;;  %v312_v39 = vld [vmem:[#allocation7 + $0x58] sm:$0xff]  ;;  %v164_v44 = vld [vmem:[#allocation5 + $0x170] sm:$0xff]  ;;  %v167_v45 = vld [vmem:[#allocation5 + $0x188] sm:$0xff] }
  0x75   :  { %800 = vmatprep.subr.bf16.mxu0 %v799_v41  ;;  %v819_v41 = vpack.c.bf16 %v165_v35, %v163_v34  ;;  %v169_v46 = vld [vmem:[#allocation5 + $0x198] sm:$0xff]  ;;  %v861_v47 = vpack.c.bf16 %v312_v39, %v311_v38  ;;  %v821_v48 = vpack.c.bf16 %v164_v44, %v162_v42  ;;  %v166_v50 = vld [vmem:[#allocation5 + $0x180] sm:$0xff]  ;;  %v168_v51 = vld [vmem:[#allocation5 + $0x190] sm:$0xff]  ;;  %v1257_v29 = vsub.s32 0, %v272_v26 }
  0x76   :  { %854 = vmatpush3.bf16.msra.mxu1 %v853_v24  ;;  %v823_v49 = vpack.c.bf16 %v169_v46, %v167_v45  ;;  %v171_v52 = vld [vmem:[#allocation5 + $0x1a8] sm:$0xff]  ;;  %v173_v53 = vld [vmem:[#allocation5 + $0x1b8] sm:$0xff]  ;;  %v170_v56 = vld [vmem:[#allocation5 + $0x1a0] sm:$0xff]  ;;  %v277_v30 = vsub.s32 1, %v272_v26 }
  0x77   :  { %856 = vmatprep.subr.bf16.mxu1 %v855_v25  ;;  %v827_v55 = vpack.c.bf16 %v173_v53, %v171_v52  ;;  %v172_v57 = vld [vmem:[#allocation5 + $0x1b0] sm:$0xff]  ;;  %v175_v58 = vld [vmem:[#allocation5 + $0x1c8] sm:$0xff]  ;;  %v174_v62 = vld [vmem:[#allocation5 + $0x1c0] sm:$0xff] }
  0x78   :  { %802 = vmatpush1.bf16.msra.mxu0 %v801_v54  ;;  %v825_v54 = vpack.c.bf16 %v168_v51, %v166_v50  ;;  %v829_v60 = vpack.c.bf16 %v172_v57, %v170_v56  ;;  %v176_v63 = vld [vmem:[#allocation5 + $0x1d0] sm:$0xff]  ;;  %v179_v0 = vld [vmem:[#allocation5 + $0x1e8] sm:$0xff]  ;;  %v181_v1 = vld [vmem:[#allocation5 + $0x1f8] sm:$0xff] }
  0x79   :  { %804 = vmatprep.subr.bf16.mxu0 %v803_v59  ;;  %v177_v59 = vld [vmem:[#allocation5 + $0x1d8] sm:$0xff]  ;;  %v833_v2 = vpack.c.bf16 %v176_v63, %v174_v62  ;;  %v835_v3 = vpack.c.bf16 %v181_v1, %v179_v0  ;;  %v180_v5 = vld [vmem:[#allocation5 + $0x1f0] sm:$0xff]  ;;  %v330_v8 = vld [vmem:[#allocation7 + $0xe8] sm:$0xff] }
  0x7a   :  { %858 = vmatpush3.bf16.msra.mxu1 %v857_v36  ;;  %v831_v61 = vpack.c.bf16 %v177_v59, %v175_v58  ;;  %v313_v10 = vld [vmem:[#allocation7 + $0x60] sm:$0xff]  ;;  %v314_v11 = vld [vmem:[#allocation7 + $0x68] sm:$0xff]  ;;  %v331_v13 = vld [vmem:[#allocation7 + $0xf0] sm:$0xff] }
  0x7b   :  { %860 = vmatprep.subr.bf16.mxu1 %v859_v37  ;;  %v865_v12 = vpack.c.bf16 %v314_v11, %v313_v10  ;;  %v332_v14 = vld [vmem:[#allocation7 + $0xf8] sm:$0xff]  ;;  %v428_v42 = vld [vmem:[#allocation8 + $0x8] sm:$0xff]  ;;  %v431_v51 = vld [vmem:[#allocation8 + $0x20] sm:$0xff] }
  0x7c   :  { %806 = vmatpush1.bf16.msra.mxu0 %v805_v4  ;;  %v178_v4 = vld [vmem:[#allocation5 + $0x1e0] sm:$0xff]  ;;  %v867_v15 = vpack.c.bf16 %v332_v14, %v331_v13  ;;  %v316_v17 = vld [vmem:[#allocation7 + $0x78] sm:$0xff]  ;;  %v432_v52 = vld [vmem:[#allocation8 + $0x28] sm:$0xff] }
  0x7d   :  { %808 = vmatprep.subr.bf16.mxu0 %v807_v7  ;;  %v837_v6 = vpack.c.bf16 %v180_v5, %v178_v4  ;;  %v329_v7 = vld [vmem:[#allocation7 + $0xe0] sm:$0xff]  ;;  %v266_v22 = vld [vmem:[%s1309_s2] sm:$0x3]  ;;  %v878_v53 = vpack.c.bf16 %v432_v52, %v431_v51  ;;  %v436_v58 = vld [vmem:[#allocation8 + $0x48] sm:$0xff]  ;;  %v1087_v5 = vmov 0.0  }
  0x7e   :  { %862 = vmatpush3.bf16.msra.mxu1 %v861_v47  ;;  %v863_v9 = vpack.c.bf16 %v330_v8, %v329_v7  ;;  %v264_v25 = vld [vmem:[%s1311_s4] sm:$0x3]  ;;  %v435_v57 = vld [vmem:[#allocation8 + $0x40] sm:$0xff]  ;;  %v440_v0 = vld [vmem:[#allocation8 + $0x68] sm:$0xff] }
  0x7f   :  { %v884_v59 = vpack.c.bf16 %v436_v58, %v435_v57  ;;  %v439_v63 = vld [vmem:[#allocation8 + $0x60] sm:$0xff]  ;;  %v521_v7 = vld [vmem:[#allocation10 + $0x8] sm:$0xff]  ;;  %v522_v8 = vld [vmem:[#allocation10 + $0x10] sm:$0xff] }
  0x80   :  { %810 = vmatpush1.bf16.msra.mxu0 %v809_v16  ;;  %864 = vmatprep.subr.bf16.mxu1 %v863_v9  ;;  %v315_v16 = vld [vmem:[#allocation7 + $0x70] sm:$0xff]  ;;  %v890_v1 = vpack.c.bf16 %v440_v0, %v439_v63  ;;  %v523_v10 = vld [vmem:[#allocation10 + $0x18] sm:$0xff]  ;;  %v525_v13 = vld [vmem:[#allocation10 + $0x28] sm:$0xff] }
  0x81   :  { %812 = vmatprep.subr.bf16.mxu0 %v811_v19  ;;  %v869_v18 = vpack.c.bf16 %v316_v17, %v315_v16  ;;  %v1085_v19 = vmov 0.0|0.0   ;;  %v899_v11 = vpack.c.bf16 %v523_v10, %v522_v8  ;;  %v527_v16 = vld [vmem:[#allocation10 + $0x38] sm:$0xff] }
  0x82   :  { %866 = vmatpush3.bf16.msra.mxu1 %v865_v12  ;;  %v524_v12 = vld [vmem:[#allocation10 + $0x20] sm:$0xff] }
  0x83   :  { %868 = vmatprep.subr.bf16.mxu1 %v867_v15  ;;  %v902_v14 = vpack.c.bf16 %v525_v13, %v524_v12  ;;  %v526_v15 = vld [vmem:[#allocation10 + $0x30] sm:$0xff] }
  0x84   :  { %814 = vmatpush1.bf16.msra.mxu0 %v813_v28  ;;  %v283_v28 = vld [vmem:[%s1310_s3] sm:$0x3]  ;;  %v905_v17 = vpack.c.bf16 %v527_v16, %v526_v15 }
  0x85   :  { %816 = vmatprep.subr.bf16.mxu0 %v815_v31 }
  0x86   :  { %870 = vmatpush3.bf16.msra.mxu1 %v869_v18  ;;  %v528_v18 = vld [vmem:[#allocation10 + $0x40] sm:$0xff] }
  0x87   :  { %871 = vmatprep.subr.bf16.mxu1 %v1085_v19 }
  0x88   :  { %818 = vmatpush1.bf16.msra.mxu0 %v817_v40 }
  0x89   :  { %820 = vmatprep.subr.bf16.mxu0 %v819_v41  ;;  %v427_v41 = vld [vmem:[#allocation8] sm:$0xff] }
  0x8a   :  { %v872_v46 = vpack.c.bf16 %v428_v42, %v427_v41 }
  0x8c   :  { %822 = vmatpush1.bf16.msra.mxu0 %v821_v48  ;;  %v429_v48 = vld [vmem:[#allocation8 + $0x10] sm:$0xff] }
  0x8d   :  { %824 = vmatprep.subr.bf16.mxu0 %v823_v49  ;;  %v430_v49 = vld [vmem:[#allocation8 + $0x18] sm:$0xff] }
  0x8e   :  { %v875_v50 = vpack.c.bf16 %v430_v49, %v429_v48  ;;  %v634_v48 = vld [vmem:[%s1319_s12] ss:$0 sm:$0xff] }
  0x90   :  { %826 = vmatpush1.bf16.msra.mxu0 %v825_v54  ;;  %v433_v54 = vld [vmem:[#allocation8 + $0x30] sm:$0xff] }
  0x91   :  { %828 = vmatprep.subr.bf16.mxu0 %v827_v55  ;;  %v434_v55 = vld [vmem:[#allocation8 + $0x38] sm:$0xff] }
  0x92   :  { %v881_v56 = vpack.c.bf16 %v434_v55, %v433_v54 }
  0x94   :  { %830 = vmatpush1.bf16.msra.mxu0 %v829_v60  ;;  %v437_v60 = vld [vmem:[#allocation8 + $0x50] sm:$0xff] }
  0x95   :  { %832 = vmatprep.subr.bf16.mxu0 %v831_v61  ;;  %v438_v61 = vld [vmem:[#allocation8 + $0x58] sm:$0xff] }
  0x96   :  { %v887_v62 = vpack.c.bf16 %v438_v61, %v437_v60 }
  0x98   :  { %834 = vmatpush1.bf16.msra.mxu0 %v833_v2  ;;  %v441_v2 = vld [vmem:[#allocation8 + $0x70] sm:$0xff] }
  0x99   :  { %836 = vmatprep.subr.bf16.mxu0 %v835_v3  ;;  %v442_v3 = vld [vmem:[#allocation8 + $0x78] sm:$0xff] }
  0x9a   :  { %v893_v4 = vpack.c.bf16 %v442_v3, %v441_v2 }
  0x9c   :  { %838 = vmatpush1.bf16.msra.mxu0 %v837_v6  ;;  %v520_v6 = vld [vmem:[#allocation10] sm:$0xff] }
  0x9d   :  { %895 = vmatprep.subr.bf16.mxu0 %v1085_v19  ;;  %v896_v9 = vpack.c.bf16 %v521_v7, %v520_v6 }
  0x9f   :  { %258 = vmatmul.mubr.f32.vlgmr.msra.gmra.mrb[0].mxu0 %v1238_v43  ;;  %v265_v43 = vld [vmem:[%s1312_s5] sm:$0x3] }
  0xa0   :  { %v267_v20 = vadd.f32 1e-05, %v265_v43  ;;  %772 = vmatprep.mubr.msk.f32.mxu0 %vm1086_vm0, %v1087_v5  ;;  %897 = vmatpush3.bf16.msra.mxu0 %v896_v9  ;;  %v529_v43 = vld [vmem:[#allocation10 + $0x48] sm:$0xff] }
  0xa1   :  { %898 = vmatprep.subr.bf16.mxu0 %v1085_v19 }
  0xa2   :  { %932 = vrsqrt.f32 %v267_v20  ;;  %v908_v20 = vpack.c.bf16 %v529_v43, %v528_v18 }
  0xa4   :  { %900 = vmatpush3.bf16.msra.mxu0 %v899_v11 }
  0xa5   :  { %901 = vmatprep.subr.bf16.mxu0 %v1085_v19 }
  0xa8   :  { %903 = vmatpush3.bf16.msra.mxu0 %v902_v14 }
  0xa9   :  { %904 = vmatprep.subr.bf16.mxu0 %v1085_v19 }
  0xac   :  { %v933_v21 = vpop.eup %932  ;;  %906 = vmatpush3.bf16.msra.mxu0 %v905_v17 }
  0xad   :  { %v269_v24 = vmul.f32 %v933_v21, %v266_v22  ;;  %907 = vmatprep.subr.bf16.mxu0 %v1085_v19  ;;  %v530_v21 = vld [vmem:[#allocation10 + $0x50] sm:$0xff]  ;;  %v531_v22 = vld [vmem:[#allocation10 + $0x58] sm:$0xff] }
  0xae   :  { %v911_v23 = vpack.c.bf16 %v531_v22, %v530_v21 }
  0xaf   :  { %v284_v27 = vmul.f32 %v269_v24, %v264_v25  ;;  %v274_v32 = vrot.slane %v269_v24, %v1257_v29  ;;  %v278_v33 = vrot.slane %v269_v24, %v277_v30  ;;  %v532_v24 = vld [vmem:[#allocation10 + $0x60] sm:$0xff]  ;;  %v533_v25 = vld [vmem:[#allocation10 + $0x68] sm:$0xff] }
  0xb0   :  { %909 = vmatpush3.bf16.msra.mxu0 %v908_v20  ;;  %v914_v26 = vpack.c.bf16 %v533_v25, %v532_v24 }
  0xb1   :  { %v285_v31 = vsub.f32 %v283_v28, %v284_v27  ;;  %910 = vmatprep.subr.bf16.mxu0 %v1085_v19  ;;  %v404_v27 = vld [vmem:[%s1317_s10] sm:$0x1] }
  0xb2   :  { %v406_v28 = vadd.f32 1e-05, %v404_v27 }
  0xb3   :  { %v290_v34 = vrot.slane %v285_v31, %v1257_v29  ;;  %v294_v36 = vrot.slane %v285_v31, %v277_v30  ;;  %v405_v31 = vld [vmem:[%s1314_s7] sm:$0x1] }
  0xb4   :  { %912 = vmatpush3.bf16.msra.mxu0 %v911_v23  ;;  %934 = vrsqrt.f32 %v406_v28 }
  0xb5   :  { %913 = vmatprep.subr.bf16.mxu0 %v1085_v19 }
  0xb8   :  { %915 = vmatpush3.bf16.msra.mxu0 %v914_v26 }
  0xb9   :  { %916 = vmatprep.subr.bf16.mxu0 %v1085_v19 }
  0xbe   :  { %v935_v30 = vpop.eup %934 }
 0x172   :  { %v259_v35 = vpop.f32.mrb[0].mxu0 }
 0x173   :  { %v281_v37 = vmul.f32 %v274_v32, %v259_v35  ;;  %v261_v38 = vpop.f32.mrb[1].mxu0  ;;  %v408_v32 = vmul.f32 %v935_v30, %v405_v31 }
 0x174   :  { %v282_v39 = vmul.f32 %v278_v33, %v261_v38  ;;  %v403_v33 = vld [vmem:[%s1316_s9] sm:$0x1] }
 0x175   :  { %v297_v40 = vadd.f32 %v290_v34, %v281_v37  ;;  %v417_v34 = vmul.f32 %v408_v32, %v403_v33  ;;  %v413_v37 = vrot.slane %v408_v32, %v1257_v29 }
 0x176   :  { %v298_v44 = vadd.f32 %v294_v36, %v282_v39 }
 0x177   :  { %v299_v47 = vmax.f32 %v297_v40, 0.0 }
 0x178   :  { %v300_v45 = vmax.f32 %v298_v44, 0.0 }
 0x17a   :  { %397 = vmatprep.mubr.f32.mxu1 %v300_v45  ;;  %v534_v45 = vld [vmem:[#allocation10 + $0x70] sm:$0xff] }
 0x17b   :  { %398 = vmatmul.mubr.f32.vlgmr.msra.gmra.mrb[0].mxu1 %v299_v47 }
 0x17c   :  { %873 = vmatpush3.bf16.msra.mxu1 %v872_v46  ;;  %737 = vmatprep.mubr.msk.f32.mxu1 %vm1086_vm0, %v1087_v5  ;;  %v535_v46 = vld [vmem:[#allocation10 + $0x78] sm:$0xff] }
 0x17d   :  { %874 = vmatprep.subr.bf16.mxu1 %v1085_v19  ;;  %v917_v47 = vpack.c.bf16 %v535_v46, %v534_v45 }
 0x17f   :  { %918 = vmatpush3.bf16.msra.mxu0 %v917_v47 }
 0x180   :  { %876 = vmatpush3.bf16.msra.mxu1 %v875_v50 }
 0x181   :  { %877 = vmatprep.subr.bf16.mxu1 %v1085_v19 }
 0x184   :  { %879 = vmatpush3.bf16.msra.mxu1 %v878_v53 }
 0x185   :  { %880 = vmatprep.subr.bf16.mxu1 %v1085_v19 }
 0x188   :  { %882 = vmatpush3.bf16.msra.mxu1 %v881_v56 }
 0x189   :  { %883 = vmatprep.subr.bf16.mxu1 %v1085_v19 }
 0x18c   :  { %885 = vmatpush3.bf16.msra.mxu1 %v884_v59 }
 0x18d   :  { %886 = vmatprep.subr.bf16.mxu1 %v1085_v19 }
 0x190   :  { %888 = vmatpush3.bf16.msra.mxu1 %v887_v62 }
 0x191   :  { %889 = vmatprep.subr.bf16.mxu1 %v1085_v19 }
 0x194   :  { %891 = vmatpush3.bf16.msra.mxu1 %v890_v1 }
 0x195   :  { %892 = vmatprep.subr.bf16.mxu1 %v1085_v19  ;;  %v416_v19 = vld [vmem:[%s1315_s8] sm:$0x1] }
 0x196   :  { %v418_v35 = vsub.f32 %v416_v19, %v417_v34 }
 0x198   :  { %894 = vmatpush3.bf16.msra.mxu1 %v893_v4  ;;  %v423_v40 = vrot.slane %v418_v35, %v1257_v29  ;;  %v635_v29 = vld [vmem:[%s1321_s14] ss:$0 sm:$0xff] }
 0x24e   :  { %v668_v36 = vpop.f32.mrb[0].mxu1 }
 0x24f   :  { %v669_v38 = vpop.f32.mrb[1].mxu1 }
 0x250   :  { %v670_v39 = vadd.f32 %v669_v38, %v668_v36 }
 0x252   :  { %v415_v41 = vmul.f32 %v670_v39, %v413_v37 }
 0x254   :  { %v425_v42 = vadd.f32 %v423_v40, %v415_v41 }
 0x256   :  { %v426_v44 = vmax.f32 %v425_v42, 0.0 }
 0x258   :  { %738 = vmatmul.mubr.f32.vlgmr.msra.gmra.mrb[2].mxu1 %v426_v44 }
 0x32b   :  { %v516_v49 = vpop.f32.mrb[2].mxu1 }
 0x32c   :  { %v517_v50 = vadd.f32 %v634_v48, %v516_v49  ;;  %v739_v51 = vpop.f32.mrb[3].mxu1 }
 0x32e   :  { %773 = vmatmul.mubr.f32.vlgmr.msra.gmra.mrb[2].mxu0 %v517_v50 }
 0x401   :  { %v609_v52 = vpop.f32.mrb[2].mxu0 }
 0x402   :  { %v610_v53 = vadd.f32 %v635_v29, %v609_v52  ;;  %v774_v54 = vpop.f32.mrb[3].mxu0 }
 0x404   :  { %v613_v55 = vmul.f32 0.2, %v610_v53 }
 0x406   :  { %v614_v56 = vmax.f32 %v610_v53, %v613_v55 }
 0x408   :  { %615 = vst [vmem:[#allocation11] sm:$0x3] %v614_v56 }
 0x409   :  { %1057 = shalt.err (!%p1054_p2)
}
 0x40a   :  { %s1325_s30 = sld [smem:[#allocation16_spill]] }
 0x410   :  { %s1058_s14 = scalar_lea.hbm %s1325_s30, 32 }
 0x411   :  { %p1059_p3 = scmp.ne.s32.totalorder %s1325_s30, %s1058_s14  ;;  %p1062_p4 = scmp.lt.u32.totalorder %s1058_s14, %s1325_s30 }
 0x413   :  { %p1064_p5 = pnand %p1062_p4, %p1059_p3 }
 0x415   :  { %1067 = shalt.err (!%p1064_p5)
}
 0x416   :  { %625 = dma.vmem_to_hbm [thread:$0]  %s623_s18, 32, %s1325_s30, [#allocation4]  }
 0x417   :  { %1074 = dma.done.wait [#allocation4], 32  }
 0x418   :  { %1075 = vsyncadd [#allocation4], 4294967264 }
 0x419   :  { %629 = vsyncpa [#allocation3], 1 }
 0x41a   :  { %630 = vsyncpa [#allocation6], 1 }
 0x41b   :  { %631 = vsyncpa [#allocation9], 1 }
 0x41c   :  { %632 = vsyncpa [#allocation4], 1 }

</bundles_post_ra>
